<compile_context>
chip_gen: v5e
topology: v5e:2x2
jax: 0.10.0
libtpu: 0.0.40
codegen_flags: <defaults>
</compile_context>

<pallas_src>
import jax
import jax.numpy as jnp
from jax.experimental import pallas as pl
from jax.experimental.pallas import tpu as pltpu

LANE = 128          # lane width: pad all feature dims to a multiple of this
SUBLANE = 8         # sublane granularity for the batch axis
MAX_BATCH_TILE = 512  # batch rows per grid step (fits easily in v7x's 64 MiB VMEM)


def _round_up(n, m):
    return ((n + m - 1) // m) * m


def _mlp_kernel(x_ref, w1_ref, b1_ref, w2_ref, b2_ref, w3_ref, b3_ref, o_ref):
    # Layer 1: bf16 MXU matmul, f32 accumulation; bias + ReLU in f32 (VPU).
    h1 = jnp.dot(x_ref[...], w1_ref[...], preferred_element_type=jnp.float32)
    h1 = jnp.maximum(h1 + b1_ref[...], 0.0)
    # Layer 2
    h2 = jnp.dot(h1.astype(w2_ref.dtype), w2_ref[...],
                 preferred_element_type=jnp.float32)
    h2 = jnp.maximum(h2 + b2_ref[...], 0.0)
    # Layer 3 (no activation)
    out = jnp.dot(h2.astype(w3_ref.dtype), w3_ref[...],
                  preferred_element_type=jnp.float32)
    o_ref[...] = (out + b3_ref[...]).astype(o_ref.dtype)


def init_params(key, input_dim, hidden_dim, output_dim):
    """Deterministic synthetic init matching torch nn.Linear parameter shapes."""
    k1, k2, k3, k4, k5, k6 = jax.random.split(key, 6)

    def u(k, shape, fan_in):
        bound = 1.0 / jnp.sqrt(fan_in)
        return jax.random.uniform(k, shape, jnp.float32, -bound, bound)

    return {
        "w1": u(k1, (hidden_dim, input_dim), input_dim),
        "b1": u(k2, (hidden_dim,), input_dim),
        "w2": u(k3, (hidden_dim, hidden_dim), hidden_dim),
        "b2": u(k4, (hidden_dim,), hidden_dim),
        "w3": u(k5, (output_dim, hidden_dim), hidden_dim),
        "b3": u(k6, (output_dim,), hidden_dim),
    }


def prepare_params(params, compute_dtype=jnp.bfloat16):
    """One-time prep (load time, NOT per forward call):
       transpose to (in, out), zero-pad feature dims to 128 lanes, cast the
       matmul operands to bf16. Biases stay f32 for the VPU add."""
    hid, in_dim = params["w1"].shape
    out_dim = params["w3"].shape[0]
    in_p = _round_up(in_dim, LANE)
    hid_p = _round_up(hid, LANE)
    out_p = _round_up(out_dim, LANE)

    def pad_w(w_t, rows, cols):
        return jnp.pad(w_t, ((0, rows - w_t.shape[0]),
                             (0, cols - w_t.shape[1]))).astype(compute_dtype)

    def pad_b(b, cols):
        return jnp.pad(b, (0, cols - b.shape[0])).reshape(1, cols).astype(jnp.float32)

    return {
        "w1": pad_w(params["w1"].T, in_p, hid_p),
        "w2": pad_w(params["w2"].T, hid_p, hid_p),
        "w3": pad_w(params["w3"].T, hid_p, out_p),
        "b1": pad_b(params["b1"], hid_p),
        "b2": pad_b(params["b2"], hid_p),
        "b3": pad_b(params["b3"], out_p),
        "dims": (in_dim, hid, out_dim),
    }


def crop_mlp_forward(x, prep):
    """x: (batch, input_dim) float32. prep: output of prepare_params."""
    batch, in_dim = x.shape
    in_p, hid_p = prep["w1"].shape
    out_p = prep["w3"].shape[1]
    out_dim = prep["dims"][2]
    cdtype = prep["w1"].dtype

    # Pad batch to sublane granularity and pick the batch tile.
    bp = _round_up(batch, SUBLANE)
    tb = MAX_BATCH_TILE if bp > MAX_BATCH_TILE else bp
    bp = _round_up(bp, tb)

    # Zero-pad x to (bp, in_p) and cast to bf16 (halves x DMA bytes).
    xp = jnp.zeros((bp, in_p), cdtype).at[:batch, :in_dim].set(x.astype(cdtype))

    grid = (bp // tb,)

    flops = 2 * bp * (in_p * hid_p + hid_p * hid_p + hid_p * out_p)
    bytes_accessed = (
        xp.size * xp.dtype.itemsize
        + sum(prep[k].size * prep[k].dtype.itemsize
              for k in ("w1", "w2", "w3", "b1", "b2", "b3"))
        + bp * out_p * 4
    )

    def resident(shape):
        # Same block index at every grid step -> DMA'd once, stays in VMEM.
        return pl.BlockSpec(shape, lambda i: (0, 0))

    out_padded = pl.pallas_call(
        _mlp_kernel,
        out_shape=jax.ShapeDtypeStruct((bp, out_p), jnp.float32),
        grid=grid,
        in_specs=[
            pl.BlockSpec((tb, in_p), lambda i: (i, 0)),  # x: tiled over batch
            resident((in_p, hid_p)),                     # w1
            resident((1, hid_p)),                        # b1
            resident((hid_p, hid_p)),                    # w2
            resident((1, hid_p)),                        # b2
            resident((hid_p, out_p)),                    # w3
            resident((1, out_p)),                        # b3
        ],
        out_specs=pl.BlockSpec((tb, out_p), lambda i: (i, 0)),
        compiler_params=pltpu.CompilerParams(
            dimension_semantics=("parallel",),
        ),
        cost_estimate=pl.CostEstimate(
            flops=flops, transcendentals=0, bytes_accessed=bytes_accessed),
    )(xp, prep["w1"], prep["b1"], prep["w2"], prep["b2"], prep["w3"], prep["b3"])

    # Strip batch / lane padding (padded output columns are exactly zero).
    return out_padded[:batch, :out_dim]


def _reference_f32(x, params):
    """Faithful f32 reference of the PyTorch module."""
    h1 = jnp.maximum(x @ params["w1"].T + params["b1"], 0.0)
    h2 = jnp.maximum(h1 @ params["w2"].T + params["b2"], 0.0)
    return h2 @ params["w3"].T + params["b3"]


def _reference_bf16(x, params):
    """Mirrors the kernel's numerics: bf16 MXU inputs, f32 accumulate/activations."""
    bf = jnp.bfloat16

    def lin(a, w, b):
        return jnp.dot(a.astype(bf), w.T.astype(bf),
                       preferred_element_type=jnp.float32) + b

    h1 = jnp.maximum(lin(x, params["w1"], params["b1"]), 0.0)
    h2 = jnp.maximum(lin(h1, params["w2"], params["b2"]), 0.0)
    return lin(h2, params["w3"], params["b3"])


if __name__ == "__main__":
    input_dim, hidden_dim, output_dim = 16, 32, 8

    key = jax.random.PRNGKey(0)
    kx, kp, kx2 = jax.random.split(key, 3)
    params = init_params(kp, input_dim, hidden_dim, output_dim)
    prep = prepare_params(params)  # one-time: transpose + pad + bf16 cast

    # Small batch (module's typical use) -> single grid step.
    batch = 8
    x = jax.random.normal(kx, (batch, input_dim), jnp.float32)
    out = jax.block_until_ready(crop_mlp_forward(x, prep))
    assert out.shape == (batch, output_dim)
    assert jnp.allclose(out, _reference_bf16(x, params), atol=1e-4, rtol=1e-4), \
        "mismatch vs bf16-matched reference"
    assert jnp.allclose(out, _reference_f32(x, params), atol=1e-1, rtol=1e-1), \
        "mismatch vs f32 reference (beyond bf16 tolerance)"

    # Larger batch exercises the pipelined batch grid (multiple 512-row tiles,
    # resident weights, parallel semantics for v7x megacore).
    batch2 = 1536
    x2 = jax.random.normal(kx2, (batch2, input_dim), jnp.float32)
    out2 = jax.block_until_ready(crop_mlp_forward(x2, prep))
    assert out2.shape == (batch2, output_dim)
    assert jnp.allclose(out2, _reference_bf16(x2, params), atol=1e-4, rtol=1e-4), \
        "mismatch vs bf16-matched reference (batched)"

    print("KERNEL_OK")
</pallas_src>

<mosaic_0001>
module attributes {stable_mosaic.version = 11 : i64} {
  func.func @_mlp_kernel(%arg0: i32, %arg1: memref<8x128xbf16, #tpu.memory_space<vmem>>, %arg2: memref<128x128xbf16, #tpu.memory_space<vmem>>, %arg3: memref<1x128xf32, #tpu.memory_space<vmem>>, %arg4: memref<128x128xbf16, #tpu.memory_space<vmem>>, %arg5: memref<1x128xf32, #tpu.memory_space<vmem>>, %arg6: memref<128x128xbf16, #tpu.memory_space<vmem>>, %arg7: memref<1x128xf32, #tpu.memory_space<vmem>>, %arg8: memref<8x128xf32, #tpu.memory_space<vmem>>) attributes {dimension_semantics = [#tpu.dimension_semantics<parallel>], iteration_bounds = array<i64: 1>, scalar_prefetch = 0 : i64, scratch_operands = 0 : i64, tpu.core_type = #tpu.core_type<tc>, window_params = [{transform_indices = @transform_0, window_bounds = array<i64: 8, 128>}, {pipeline_mode = #tpu.pipeline_mode<synchronous>, transform_indices = @transform_1, window_bounds = array<i64: 128, 128>}, {pipeline_mode = #tpu.pipeline_mode<synchronous>, transform_indices = @transform_2, window_bounds = array<i64: 1, 128>}, {pipeline_mode = #tpu.pipeline_mode<synchronous>, transform_indices = @transform_3, window_bounds = array<i64: 128, 128>}, {pipeline_mode = #tpu.pipeline_mode<synchronous>, transform_indices = @transform_4, window_bounds = array<i64: 1, 128>}, {pipeline_mode = #tpu.pipeline_mode<synchronous>, transform_indices = @transform_5, window_bounds = array<i64: 128, 128>}, {pipeline_mode = #tpu.pipeline_mode<synchronous>, transform_indices = @transform_6, window_bounds = array<i64: 1, 128>}, {transform_indices = @transform_7, window_bounds = array<i64: 8, 128>}]} {
    %c0 = arith.constant 0 : index
    %c0_0 = arith.constant 0 : index
    %0 = vector.load %arg1[%c0, %c0_0] : memref<8x128xbf16, #tpu.memory_space<vmem>>, vector<8x128xbf16>
    %c0_1 = arith.constant 0 : index
    %c0_2 = arith.constant 0 : index
    %1 = vector.load %arg2[%c0_1, %c0_2] : memref<128x128xbf16, #tpu.memory_space<vmem>>, vector<128x128xbf16>
    %cst = arith.constant dense<0.000000e+00> : vector<8x128xf32>
    %2 = tpu.matmul %0, %1, %cst {dimension_numbers = #tpu.dot_dimension_numbers<[1], [0], [0], [1], [0, 0, 1, 1], [], []>} : vector<8x128xbf16>, vector<128x128xbf16>, vector<8x128xf32> -> vector<8x128xf32>
    %c0_3 = arith.constant 0 : index
    %c0_4 = arith.constant 0 : index
    %3 = vector.load %arg3[%c0_3, %c0_4] : memref<1x128xf32, #tpu.memory_space<vmem>>, vector<1x128xf32>
    %4 = vector.broadcast %3 : vector<1x128xf32> to vector<8x128xf32>
    %5 = arith.addf %2, %4 : vector<8x128xf32>
    %cst_5 = arith.constant 0.000000e+00 : f32
    %6 = vector.broadcast %cst_5 : f32 to vector<8x128xf32>
    %7 = arith.maximumf %5, %6 : vector<8x128xf32>
    %8 = arith.truncf %7 : vector<8x128xf32> to vector<8x128xbf16>
    %c0_6 = arith.constant 0 : index
    %c0_7 = arith.constant 0 : index
    %9 = vector.load %arg4[%c0_6, %c0_7] : memref<128x128xbf16, #tpu.memory_space<vmem>>, vector<128x128xbf16>
    %cst_8 = arith.constant dense<0.000000e+00> : vector<8x128xf32>
    %10 = tpu.matmul %8, %9, %cst_8 {dimension_numbers = #tpu.dot_dimension_numbers<[1], [0], [0], [1], [0, 0, 1, 1], [], []>} : vector<8x128xbf16>, vector<128x128xbf16>, vector<8x128xf32> -> vector<8x128xf32>
    %c0_9 = arith.constant 0 : index
    %c0_10 = arith.constant 0 : index
    %11 = vector.load %arg5[%c0_9, %c0_10] : memref<1x128xf32, #tpu.memory_space<vmem>>, vector<1x128xf32>
    %12 = vector.broadcast %11 : vector<1x128xf32> to vector<8x128xf32>
    %13 = arith.addf %10, %12 : vector<8x128xf32>
    %cst_11 = arith.constant 0.000000e+00 : f32
    %14 = vector.broadcast %cst_11 : f32 to vector<8x128xf32>
    %15 = arith.maximumf %13, %14 : vector<8x128xf32>
    %16 = arith.truncf %15 : vector<8x128xf32> to vector<8x128xbf16>
    %c0_12 = arith.constant 0 : index
    %c0_13 = arith.constant 0 : index
    %17 = vector.load %arg6[%c0_12, %c0_13] : memref<128x128xbf16, #tpu.memory_space<vmem>>, vector<128x128xbf16>
    %cst_14 = arith.constant dense<0.000000e+00> : vector<8x128xf32>
    %18 = tpu.matmul %16, %17, %cst_14 {dimension_numbers = #tpu.dot_dimension_numbers<[1], [0], [0], [1], [0, 0, 1, 1], [], []>} : vector<8x128xbf16>, vector<128x128xbf16>, vector<8x128xf32> -> vector<8x128xf32>
    %c0_15 = arith.constant 0 : index
    %c0_16 = arith.constant 0 : index
    %19 = vector.load %arg7[%c0_15, %c0_16] : memref<1x128xf32, #tpu.memory_space<vmem>>, vector<1x128xf32>
    %20 = vector.broadcast %19 : vector<1x128xf32> to vector<8x128xf32>
    %21 = arith.addf %18, %20 : vector<8x128xf32>
    %c0_17 = arith.constant 0 : index
    %c0_18 = arith.constant 0 : index
    %22 = vector.load %arg8[%c0_17, %c0_18] : memref<8x128xf32, #tpu.memory_space<vmem>>, vector<8x128xf32>
    tpu.vector_store %arg8[%c0_17, %c0_18], %21 {strides = array<i32>} : memref<8x128xf32, #tpu.memory_space<vmem>>, vector<8x128xf32>,
    return
  }
  func.func @transform_0(%arg0: i32) -> (i32, i32) {
    %c0_i32 = arith.constant 0 : i32
    %c0_i32_0 = arith.constant 0 : i32
    return %arg0, %c0_i32 : i32, i32
  }
  func.func @transform_1(%arg0: i32) -> (i32, i32) {
    %c0_i32 = arith.constant 0 : i32
    %c0_i32_0 = arith.constant 0 : i32
    %c0_i32_1 = arith.constant 0 : i32
    return %c0_i32, %c0_i32_0 : i32, i32
  }
  func.func @transform_2(%arg0: i32) -> (i32, i32) {
    %c0_i32 = arith.constant 0 : i32
    %c0_i32_0 = arith.constant 0 : i32
    %c0_i32_1 = arith.constant 0 : i32
    return %c0_i32, %c0_i32_0 : i32, i32
  }
  func.func @transform_3(%arg0: i32) -> (i32, i32) {
    %c0_i32 = arith.constant 0 : i32
    %c0_i32_0 = arith.constant 0 : i32
    %c0_i32_1 = arith.constant 0 : i32
    return %c0_i32, %c0_i32_0 : i32, i32
  }
  func.func @transform_4(%arg0: i32) -> (i32, i32) {
    %c0_i32 = arith.constant 0 : i32
    %c0_i32_0 = arith.constant 0 : i32
    %c0_i32_1 = arith.constant 0 : i32
    return %c0_i32, %c0_i32_0 : i32, i32
  }
  func.func @transform_5(%arg0: i32) -> (i32, i32) {
    %c0_i32 = arith.constant 0 : i32
    %c0_i32_0 = arith.constant 0 : i32
    %c0_i32_1 = arith.constant 0 : i32
    return %c0_i32, %c0_i32_0 : i32, i32
  }
  func.func @transform_6(%arg0: i32) -> (i32, i32) {
    %c0_i32 = arith.constant 0 : i32
    %c0_i32_0 = arith.constant 0 : i32
    %c0_i32_1 = arith.constant 0 : i32
    return %c0_i32, %c0_i32_0 : i32, i32
  }
  func.func @transform_7(%arg0: i32) -> (i32, i32) {
    %c0_i32 = arith.constant 0 : i32
    %c0_i32_0 = arith.constant 0 : i32
    return %arg0, %c0_i32 : i32, i32
  }
}

</mosaic_0001>

<bundles_post_ra>
// kernel: tpu_custom_call.1
= control target key start
LH: loop header
LB: loop body
LE: loop exit
PB: predicated region body
PF: predicated region fallthrough
CT: control target
= control target key end

     0   :  { %12 = vsyncpa [#allocation3], 0  ;;  %s685_s0 = inlined_call_operand.hbm [shape: bf16[8,128], index: 0, kind: input, shape index: {}]   ;;  %s686_s1 = inlined_call_operand.hbm [shape: bf16[128,128], index: 1, kind: input, shape index: {}]   ;;  %s687_s2 = inlined_call_operand.vmem [shape: f32[1,128], index: 2, kind: input, shape index: {}]   ;;  %s688_s3 = inlined_call_operand.hbm [shape: bf16[128,128], index: 3, kind: input, shape index: {}]   ;;  %s689_s4 = inlined_call_operand.vmem [shape: f32[1,128], index: 4, kind: input, shape index: {}]   ;;  %s690_s5 = inlined_call_operand.hbm [shape: bf16[128,128], index: 5, kind: input, shape index: {}]   ;;  %s691_s6 = inlined_call_operand.vmem [shape: f32[1,128], index: 6, kind: input, shape index: {}]   ;;  %s692_s7 = inlined_call_operand.hbm [shape: f32[8,128], index: 7, kind: output, shape index: {}]  }
   0x1   :  { %13 = vsyncpa [#allocation6], 0 }
   0x2   :  { %14 = vsyncpa [#allocation9], 0  ;;  %s31_s26 = sshll.u32 %s686_s1, 4  ;;  %s32_s26 = int_to_ptr.hbm [resolvable:$true] %s31_s26 }
   0x3   :  { %15 = vsyncpa [#allocation4], 0  ;;  %s614_s27 = smov [#allocation5]   ;;  %s21_s8 = sshll.u32 %s685_s0, 4  ;;  %s22_s8 = int_to_ptr.hbm [resolvable:$true] %s21_s8 }
   0x4   :  { %s33_s28 = sshll.u32 %s614_s27, 4  ;;  %s615_s9 = smov 64   ;;  %s34_s28 = int_to_ptr.vmem [resolvable:$true] %s33_s28 }
   0x5   :  { %s616_s10 = smov 4   ;;  %s617_s11 = smov [#allocation2]  }
   0x6   :  { %39 = dma.hbm_to_vmem [thread:$0]  %s32_s26, 1024, %s34_s28, [#allocation6], %s615_s9, %s615_s9, %s616_s10  }
   0x7   :  { %s23_s12 = sshll.u32 %s617_s11, 4  ;;  %s46_s15 = sshll.u32 %s688_s3, 4  ;;  %s24_s12 = int_to_ptr.vmem [resolvable:$true] %s23_s12  ;;  %s47_s15 = int_to_ptr.hbm [resolvable:$true] %s46_s15 }
   0x8   :  { %26 = dma.hbm_to_vmem [thread:$0]  %s22_s8, 64, %s24_s12, [#allocation3]  }
   0x9   :  { %s61_s17 = sshll.u32 %s690_s5, 4  ;;  %s618_s18 = smov [#allocation7]   ;;  %s62_s17 = int_to_ptr.hbm [resolvable:$true] %s61_s17 }
   0xa   :  { %s48_s19 = sshll.u32 %s618_s18, 4  ;;  %s619_s0 = smov [#allocation8]   ;;  %s49_s19 = int_to_ptr.vmem [resolvable:$true] %s48_s19 }
   0xb   :  { %54 = dma.hbm_to_vmem [thread:$0]  %s47_s15, 1024, %s49_s19, [#allocation6], %s615_s9, %s615_s9, %s616_s10  }
   0xc   :  { %s63_s20 = sshll.u32 %s619_s0, 4  ;;  %s64_s20 = int_to_ptr.vmem [resolvable:$true] %s63_s20 }
   0xd   :  { %69 = dma.hbm_to_vmem [thread:$0]  %s62_s17, 1024, %s64_s20, [#allocation9], %s615_s9, %s615_s9, %s616_s10  }
   0xe   :  { %606 = dma.done.wait [#allocation3], 64  }
   0xf   :  { %607 = vsyncadd [#allocation3], 4294967232 }
  0x10   :  { %608 = dma.done.wait [#allocation6], 2048  }
  0x11   :  { %609 = vsyncadd [#allocation6], 4294965248 }
  0x12   :  { %610 = dma.done.wait [#allocation9], 1024  }
  0x13   :  { %611 = vsyncadd [#allocation9], 4294966272  ;;  %v459_v0 = vld [vmem:[#allocation5 + $0x38] sm:$0xff]  ;;  %v458_v1 = vld [vmem:[#allocation5 + $0x30] sm:$0xff]  ;;  %s620_s24 = smov [#allocation10]   ;;  %s344_s28 = sshll.u32 %s692_s7, 4  ;;  %s345_s28 = int_to_ptr.hbm [resolvable:$true] %s344_s28 }
  0x14   :  { %157 = vmatpush.bf16.msra.mxu0 %v459_v0  ;;  %v467_v2 = vld [vmem:[#allocation7 + $0x38] sm:$0xff]  ;;  %v466_v3 = vld [vmem:[#allocation7 + $0x30] sm:$0xff]  ;;  %v457_v4 = vld [vmem:[#allocation5 + $0x28] sm:$0xff]  ;;  %s342_s25 = sshll.u32 %s620_s24, 4  ;;  %s343_s25 = int_to_ptr.vmem [resolvable:$true] %s342_s25 }
  0x15   :  { %240 = vmatpush.bf16.msra.mxu1 %v467_v2  ;;  %v465_v5 = vld [vmem:[#allocation7 + $0x28] sm:$0xff]  ;;  %v456_v6 = vld [vmem:[#allocation5 + $0x20] sm:$0xff]  ;;  %v455_v8 = vld [vmem:[#allocation5 + $0x18] sm:$0xff] }
  0x16   :  { %v464_v7 = vld [vmem:[#allocation7 + $0x20] sm:$0xff]  ;;  %v463_v9 = vld [vmem:[#allocation7 + $0x18] sm:$0xff]  ;;  %v454_v10 = vld [vmem:[#allocation5 + $0x10] sm:$0xff] }
  0x17   :  { %v462_v11 = vld [vmem:[#allocation7 + $0x10] sm:$0xff]  ;;  %v453_v12 = vld [vmem:[#allocation5 + $0x8] sm:$0xff]  ;;  %v452_v13 = vld [vmem:[#allocation5] sm:$0xff] }
  0x18   :  { %158 = vmatpush.bf16.msra.mxu0 %v458_v1  ;;  %v88_v14 = vld [vmem:[#allocation2] sm:$0xf]  ;;  %v461_v15 = vld [vmem:[#allocation7 + $0x8] sm:$0xff]  ;;  %v460_v16 = vld [vmem:[#allocation7] sm:$0xff] }
  0x19   :  { %241 = vmatpush.bf16.msra.mxu1 %v466_v3  ;;  %v475_v17 = vld [vmem:[#allocation8 + $0x38] sm:$0xff]  ;;  %v474_v18 = vld [vmem:[#allocation8 + $0x30] sm:$0xff]  ;;  %v473_v19 = vld [vmem:[#allocation8 + $0x28] sm:$0xff] }
  0x1a   :  { %323 = vmatpush.bf16.msra.mxu2 %v475_v17  ;;  %v472_v20 = vld [vmem:[#allocation8 + $0x20] sm:$0xff]  ;;  %v471_v21 = vld [vmem:[#allocation8 + $0x18] sm:$0xff]  ;;  %v470_v22 = vld [vmem:[#allocation8 + $0x10] sm:$0xff] }
  0x1b   :  { %v483_v23 = vld [vmem:[%s687_s2] ss:$0 sm:$0xff]  ;;  %v469_v29 = vld [vmem:[#allocation8 + $0x8] sm:$0xff]  ;;  %v468_v30 = vld [vmem:[#allocation8] sm:$0xff] }
  0x1c   :  { %159 = vmatpush.bf16.msra.mxu0 %v457_v4  ;;  %v484_v31 = vld [vmem:[%s689_s4] ss:$0 sm:$0xff] }
  0x1d   :  { %242 = vmatpush.bf16.msra.mxu1 %v465_v5  ;;  %v485_v37 = vld [vmem:[%s691_s6] ss:$0 sm:$0xff] }
  0x1e   :  { %324 = vmatpush.bf16.msra.mxu2 %v474_v18 }
  0x20   :  { %160 = vmatpush.bf16.msra.mxu0 %v456_v6 }
  0x21   :  { %243 = vmatpush.bf16.msra.mxu1 %v464_v7 }
  0x22   :  { %325 = vmatpush.bf16.msra.mxu2 %v473_v19 }
  0x24   :  { %161 = vmatpush.bf16.msra.mxu0 %v455_v8 }
  0x25   :  { %244 = vmatpush.bf16.msra.mxu1 %v463_v9 }
  0x26   :  { %326 = vmatpush.bf16.msra.mxu2 %v472_v20 }
  0x28   :  { %162 = vmatpush.bf16.msra.mxu0 %v454_v10 }
  0x29   :  { %245 = vmatpush.bf16.msra.mxu1 %v462_v11 }
  0x2a   :  { %327 = vmatpush.bf16.msra.mxu2 %v471_v21 }
  0x2c   :  { %163 = vmatpush.bf16.msra.mxu0 %v453_v12 }
  0x2d   :  { %246 = vmatpush.bf16.msra.mxu1 %v461_v15 }
  0x2e   :  { %328 = vmatpush.bf16.msra.mxu2 %v470_v22 }
  0x30   :  { %164 = vmatpush.bf16.msra.mxu0 %v452_v13 }
  0x31   :  { %247 = vmatpush.bf16.msra.mxu1 %v460_v16 }
  0x32   :  { %329 = vmatpush.bf16.msra.mxu2 %v469_v29 }
  0x33   :  { %165 = vmatmul.bf16.vlgmr.msra.gmra.mxu0 %v88_v14 }
  0x36   :  { %330 = vmatpush.bf16.msra.mxu2 %v468_v30 }
  0xb0   :  { %v166_v24 = vpop.f32.mrf.mxu0 }
  0xb1   :  { %v167_v25 = vadd.f32 %v483_v23, %v166_v24 }
  0xb3   :  { %v170_v26 = vmax.f32 %v167_v25, 0.0 }
  0xb5   :  { %v171_v27 = vpack.c.bf16 %v170_v26, %v170_v26 }
  0xb7   :  { %248 = vmatmul.bf16.vlgmr.msra.gmra.mxu1 %v171_v27 }
  0xb8   :  { %v168_v28 = vpop.f32.mrf.mxu0 }
 0x134   :  { %v249_v32 = vpop.f32.mrf.mxu1 }
 0x135   :  { %v250_v33 = vadd.f32 %v484_v31, %v249_v32 }
 0x137   :  { %v253_v34 = vmax.f32 %v250_v33, 0.0 }
 0x139   :  { %v254_v35 = vpack.c.bf16 %v253_v34, %v253_v34 }
 0x13b   :  { %331 = vmatmul.bf16.vlgmr.msra.gmra.mxu2 %v254_v35 }
 0x13c   :  { %v251_v36 = vpop.f32.mrf.mxu1 }
 0x1be   :  { %v332_v38 = vpop.f32.mrf.mxu2 }
 0x1bf   :  { %v333_v39 = vadd.f32 %v485_v37, %v332_v38 }
 0x1c1   :  { %336 = vst [vmem:[#allocation10] sm:$0xff] %v333_v39 }
 0x1c2   :  { %347 = dma.vmem_to_hbm [thread:$0]  %s343_s25, 128, %s345_s28, [#allocation4]  }
 0x1c6   :  { %v334_v40 = vpop.f32.mrf.mxu2 }
 0x1c7   :  { %612 = dma.done.wait [#allocation4], 128  }
 0x1c8   :  { %613 = vsyncadd [#allocation4], 4294967168 }
 0x1c9   :  { %352 = vsyncpa [#allocation3], 1 }
 0x1ca   :  { %353 = vsyncpa [#allocation6], 1 }
 0x1cb   :  { %354 = vsyncpa [#allocation9], 1 }
 0x1cc   :  { %355 = vsyncpa [#allocation4], 1 }

</bundles_post_ra>
